<compile_context>
chip_gen: v5e
topology: v5e:2x2
jax: 0.10.0
libtpu: 0.0.40
codegen_flags: <defaults>
</compile_context>

<pallas_src>
import math

import jax
import jax.numpy as jnp
from jax.experimental import pallas as pl
from jax.experimental.pallas import tpu as pltpu

_LANES = 128
_GROUP = 16        # batch elements per packed row (128 lanes / 8 features)
_SMALL_B = 1024    # below this, a kernel launch is pure fixed cost -> plain jnp
_MAX_TR = 2048     # packed rows per grid step = 32768 batch elements per step


def _round_up(v, m):
    return -(-v // m) * m


def _qnet_packed_kernel(x_ref, w1_ref, b1_ref, w2_ref, b2_ref, w3_ref, b3_ref,
                        o_ref):
    """One grid step: packed [tr, 128] x-tile -> packed [tr, 128] Q-tile.

    Lanes 8j..8j+7 of packed row r are the 8 features of batch element
    16r + j.  The block-diagonal weights kron(I16, W.T) apply each 8x8 layer
    to all 16 elements of a row with one lane-dense MXU matmul; every vreg
    lane and the output store carry live data.  Batch elements never mix, so
    the clipped garbage rows of a partial last tile are harmless.
    """
    x = x_ref[...]
    h = jnp.dot(x, w1_ref[...], preferred_element_type=jnp.float32) + b1_ref[...]
    h = jnp.maximum(h, 0.0)
    h = jnp.dot(h, w2_ref[...], preferred_element_type=jnp.float32) + b2_ref[...]
    h = jnp.maximum(h, 0.0)
    q = jnp.dot(h, w3_ref[...], preferred_element_type=jnp.float32) + b3_ref[...]
    o_ref[...] = q.astype(o_ref.dtype)


def _packed_layer(w, b):
    """Torch-layout [out<=8, in<=8] weight + [out] bias ->
    (kron(I16, W.T) zero-padded to [128, 128], bias tiled to [1, 128])."""
    out_f, in_f = w.shape
    wt = jnp.zeros((8, 8), jnp.float32).at[:in_f, :out_f].set(
        w.T.astype(jnp.float32))
    bd = jnp.kron(jnp.eye(_GROUP, dtype=jnp.float32), wt)          # [128, 128]
    bp = jnp.zeros((8,), jnp.float32).at[:out_f].set(b.astype(jnp.float32))
    return bd, jnp.tile(bp.reshape(1, 8), (1, _GROUP))              # [1, 128]


def _jnp_forward(x, params):
    """Reference / small-batch forward, identical math to the PyTorch module."""
    B, s = x.shape
    if s != 8:
        x = jnp.zeros((B, 8), x.dtype).at[:, :s].set(x)   # torch's zero-pad
    h = jnp.maximum(x @ params["w1"].T + params["b1"], 0.0)
    h = jnp.maximum(h @ params["w2"].T + params["b2"], 0.0)
    return h @ params["w3"].T + params["b3"]


def qnetwork_forward(x, params):
    """x: [B, state_size] (state_size <= 8). Returns [B, action_size] float32."""
    B, s = x.shape
    action_size = params["w3"].shape[0]
    assert s <= 8, "QNetwork expects state_size <= 8 (fc1 input is 8-wide)"

    # Small-batch fast path (the game's per-step call is B = 1..2); also the
    # general fallback for action_size > 8 which the packed layout can't hold.
    if B < _SMALL_B or action_size > 8:
        return _jnp_forward(x, params).astype(jnp.float32)

    x = x.astype(jnp.float32)
    if s < 8:                       # same zero-pad copy the torch module does
        x = jnp.zeros((B, 8), jnp.float32).at[:, :s].set(x)
    Bp = _round_up(B, _GROUP)
    if Bp != B:                     # only ragged batches pay this pad copy
        x = jnp.pad(x, ((0, Bp - B), (0, 0)))

    # Free row-major view (no transpose, no copy): [Bp, 8] -> [Bp/16, 128].
    R = Bp // _GROUP
    xp = x.reshape(R, _LANES)

    w1, b1 = _packed_layer(params["w1"], params["b1"])
    w2, b2 = _packed_layer(params["w2"], params["b2"])
    w3, b3 = _packed_layer(params["w3"], params["b3"])

    # Up to 32768 batch elements (2048 packed rows) per step, split into an
    # even number of >= 2 "parallel" steps so v7x uses both TensorCores.
    steps = max(2, pl.cdiv(R, _MAX_TR))
    if steps % 2:
        steps += 1
    tr = _round_up(pl.cdiv(R, steps), 8)      # sublane-aligned block rows
    grid = (pl.cdiv(R, tr),)

    def _resident(shape):           # constant block index -> fetched once
        return pl.BlockSpec(shape, lambda i: (0, 0))

    qp = pl.pallas_call(
        _qnet_packed_kernel,
        out_shape=jax.ShapeDtypeStruct((R, _LANES), jnp.float32),
        grid=grid,
        in_specs=[
            pl.BlockSpec((tr, _LANES), lambda i: (i, 0)),           # packed x
            _resident((_LANES, _LANES)), _resident((1, _LANES)),    # fc1
            _resident((_LANES, _LANES)), _resident((1, _LANES)),    # fc2
            _resident((_LANES, _LANES)), _resident((1, _LANES)),    # fc3
        ],
        out_specs=pl.BlockSpec((tr, _LANES), lambda i: (i, 0)),
        compiler_params=pltpu.CompilerParams(
            dimension_semantics=("parallel",),   # megacore sharding on v7x
        ),
    )(xp, w1, b1, w2, b2, w3, b3)

    # Free view back to [Bp, 8] (Q-values padded to 8 action columns).  The
    # only remaining copy is this small [B, A] slice, and only when
    # action_size < 8 or the batch was ragged; for action_size == 8 and
    # B % 16 == 0 the whole path is copy-free.
    q8 = qp.reshape(Bp, 8)
    if action_size < 8 or Bp != B:
        q8 = q8[:B, :action_size]
    return q8


def qnetwork_act(x, params):
    """Greedy action(s), matching QNetwork.act (argmax over Q-values).
    At the game's B=1..2 this rides the small-batch fast path, so fusing the
    argmax into the kernel isn't worthwhile."""
    return jnp.argmax(qnetwork_forward(x, params), axis=1).astype(jnp.int32)


def init_qnetwork_params(key, action_size):
    """PyTorch nn.Linear default init: U(-1/sqrt(fan_in), 1/sqrt(fan_in)).
    Weights in torch layout [out, in]; biases as [out] vectors."""
    def linear(k, fan_in, fan_out):
        kw, kb = jax.random.split(k)
        bound = 1.0 / math.sqrt(fan_in)
        w = jax.random.uniform(kw, (fan_out, fan_in), jnp.float32, -bound, bound)
        b = jax.random.uniform(kb, (fan_out,), jnp.float32, -bound, bound)
        return w, b

    k1, k2, k3 = jax.random.split(key, 3)
    w1, b1 = linear(k1, 8, 8)
    w2, b2 = linear(k2, 8, 8)
    w3, b3 = linear(k3, 8, action_size)
    return {"w1": w1, "b1": b1, "w2": w2, "b2": b2, "w3": w3, "b3": b3}


if __name__ == "__main__":
    key = jax.random.PRNGKey(0)
    k_params, k_x1, k_x2, k_x3 = jax.random.split(key, 4)

    action_size = 4
    params = init_qnetwork_params(k_params, action_size)

    # (1) The game's per-step call: tiny batch, state_size=5 exercises the
    #     zero-pad-to-8 path; served by the small-batch fast path.
    x_small = jax.random.normal(k_x1, (2, 5), dtype=jnp.float32)
    q_small = qnetwork_forward(x_small, params)
    jax.block_until_ready(q_small)
    assert q_small.shape == (2, action_size)
    assert jnp.allclose(q_small, _jnp_forward(x_small, params), atol=1e-5, rtol=1e-5)
    assert int(qnetwork_act(x_small, params)[0]) == int(jnp.argmax(q_small[0]))

    # (2) Pallas path, fully copy-free: B multiple of 16, s=8, even 2-step grid.
    x_mid = jax.random.normal(k_x2, (2048, 8), dtype=jnp.float32)
    q_mid = qnetwork_forward(x_mid, params)
    jax.block_until_ready(q_mid)
    assert q_mid.shape == (2048, action_size)
    assert jnp.allclose(q_mid, _jnp_forward(x_mid, params), atol=1e-4, rtol=1e-4)

    # (3) Pallas path with a ragged batch (padded to 4112) and a partial tile.
    x_big = jax.random.normal(k_x3, (4099, 8), dtype=jnp.float32)
    q_big = qnetwork_forward(x_big, params)
    jax.block_until_ready(q_big)
    assert q_big.shape == (4099, action_size)
    assert jnp.allclose(q_big, _jnp_forward(x_big, params), atol=1e-4, rtol=1e-4)

    print("KERNEL_OK")
</pallas_src>

<mosaic_0001>
module attributes {stable_mosaic.version = 11 : i64} {
  func.func @_qnet_packed_kernel(%arg0: i32, %arg1: memref<64x128xf32, #tpu.memory_space<vmem>>, %arg2: memref<128x128xf32, #tpu.memory_space<vmem>>, %arg3: memref<1x128xf32, #tpu.memory_space<vmem>>, %arg4: memref<128x128xf32, #tpu.memory_space<vmem>>, %arg5: memref<1x128xf32, #tpu.memory_space<vmem>>, %arg6: memref<128x128xf32, #tpu.memory_space<vmem>>, %arg7: memref<1x128xf32, #tpu.memory_space<vmem>>, %arg8: memref<64x128xf32, #tpu.memory_space<vmem>>) attributes {dimension_semantics = [#tpu.dimension_semantics<parallel>], iteration_bounds = array<i64: 2>, scalar_prefetch = 0 : i64, scratch_operands = 0 : i64, tpu.core_type = #tpu.core_type<tc>, window_params = [{transform_indices = @transform_0, window_bounds = array<i64: 64, 128>}, {pipeline_mode = #tpu.pipeline_mode<synchronous>, transform_indices = @transform_1, window_bounds = array<i64: 128, 128>}, {pipeline_mode = #tpu.pipeline_mode<synchronous>, transform_indices = @transform_2, window_bounds = array<i64: 1, 128>}, {pipeline_mode = #tpu.pipeline_mode<synchronous>, transform_indices = @transform_3, window_bounds = array<i64: 128, 128>}, {pipeline_mode = #tpu.pipeline_mode<synchronous>, transform_indices = @transform_4, window_bounds = array<i64: 1, 128>}, {pipeline_mode = #tpu.pipeline_mode<synchronous>, transform_indices = @transform_5, window_bounds = array<i64: 128, 128>}, {pipeline_mode = #tpu.pipeline_mode<synchronous>, transform_indices = @transform_6, window_bounds = array<i64: 1, 128>}, {transform_indices = @transform_7, window_bounds = array<i64: 64, 128>}]} {
    %c0 = arith.constant 0 : index
    %c0_0 = arith.constant 0 : index
    %0 = vector.load %arg1[%c0, %c0_0] : memref<64x128xf32, #tpu.memory_space<vmem>>, vector<64x128xf32>
    %c0_1 = arith.constant 0 : index
    %c0_2 = arith.constant 0 : index
    %1 = vector.load %arg2[%c0_1, %c0_2] : memref<128x128xf32, #tpu.memory_space<vmem>>, vector<128x128xf32>
    %cst = arith.constant dense<0.000000e+00> : vector<64x128xf32>
    %2 = tpu.matmul %0, %1, %cst {dimension_numbers = #tpu.dot_dimension_numbers<[1], [0], [0], [1], [0, 0, 1, 1], [], []>} : vector<64x128xf32>, vector<128x128xf32>, vector<64x128xf32> -> vector<64x128xf32>
    %c0_3 = arith.constant 0 : index
    %c0_4 = arith.constant 0 : index
    %3 = vector.load %arg3[%c0_3, %c0_4] : memref<1x128xf32, #tpu.memory_space<vmem>>, vector<1x128xf32>
    %4 = vector.broadcast %3 : vector<1x128xf32> to vector<64x128xf32>
    %5 = arith.addf %2, %4 : vector<64x128xf32>
    %cst_5 = arith.constant 0.000000e+00 : f32
    %6 = vector.broadcast %cst_5 : f32 to vector<64x128xf32>
    %7 = arith.maximumf %5, %6 : vector<64x128xf32>
    %c0_6 = arith.constant 0 : index
    %c0_7 = arith.constant 0 : index
    %8 = vector.load %arg4[%c0_6, %c0_7] : memref<128x128xf32, #tpu.memory_space<vmem>>, vector<128x128xf32>
    %cst_8 = arith.constant dense<0.000000e+00> : vector<64x128xf32>
    %9 = tpu.matmul %7, %8, %cst_8 {dimension_numbers = #tpu.dot_dimension_numbers<[1], [0], [0], [1], [0, 0, 1, 1], [], []>} : vector<64x128xf32>, vector<128x128xf32>, vector<64x128xf32> -> vector<64x128xf32>
    %c0_9 = arith.constant 0 : index
    %c0_10 = arith.constant 0 : index
    %10 = vector.load %arg5[%c0_9, %c0_10] : memref<1x128xf32, #tpu.memory_space<vmem>>, vector<1x128xf32>
    %11 = vector.broadcast %10 : vector<1x128xf32> to vector<64x128xf32>
    %12 = arith.addf %9, %11 : vector<64x128xf32>
    %cst_11 = arith.constant 0.000000e+00 : f32
    %13 = vector.broadcast %cst_11 : f32 to vector<64x128xf32>
    %14 = arith.maximumf %12, %13 : vector<64x128xf32>
    %c0_12 = arith.constant 0 : index
    %c0_13 = arith.constant 0 : index
    %15 = vector.load %arg6[%c0_12, %c0_13] : memref<128x128xf32, #tpu.memory_space<vmem>>, vector<128x128xf32>
    %cst_14 = arith.constant dense<0.000000e+00> : vector<64x128xf32>
    %16 = tpu.matmul %14, %15, %cst_14 {dimension_numbers = #tpu.dot_dimension_numbers<[1], [0], [0], [1], [0, 0, 1, 1], [], []>} : vector<64x128xf32>, vector<128x128xf32>, vector<64x128xf32> -> vector<64x128xf32>
    %c0_15 = arith.constant 0 : index
    %c0_16 = arith.constant 0 : index
    %17 = vector.load %arg7[%c0_15, %c0_16] : memref<1x128xf32, #tpu.memory_space<vmem>>, vector<1x128xf32>
    %18 = vector.broadcast %17 : vector<1x128xf32> to vector<64x128xf32>
    %19 = arith.addf %16, %18 : vector<64x128xf32>
    %c0_17 = arith.constant 0 : index
    %c0_18 = arith.constant 0 : index
    %20 = vector.load %arg8[%c0_17, %c0_18] : memref<64x128xf32, #tpu.memory_space<vmem>>, vector<64x128xf32>
    tpu.vector_store %arg8[%c0_17, %c0_18], %19 {strides = array<i32>} : memref<64x128xf32, #tpu.memory_space<vmem>>, vector<64x128xf32>,
    return
  }
  func.func @transform_0(%arg0: i32) -> (i32, i32) {
    %c0_i32 = arith.constant 0 : i32
    %c0_i32_0 = arith.constant 0 : i32
    return %arg0, %c0_i32 : i32, i32
  }
  func.func @transform_1(%arg0: i32) -> (i32, i32) {
    %c0_i32 = arith.constant 0 : i32
    %c0_i32_0 = arith.constant 0 : i32
    %c0_i32_1 = arith.constant 0 : i32
    return %c0_i32, %c0_i32_0 : i32, i32
  }
  func.func @transform_2(%arg0: i32) -> (i32, i32) {
    %c0_i32 = arith.constant 0 : i32
    %c0_i32_0 = arith.constant 0 : i32
    %c0_i32_1 = arith.constant 0 : i32
    return %c0_i32, %c0_i32_0 : i32, i32
  }
  func.func @transform_3(%arg0: i32) -> (i32, i32) {
    %c0_i32 = arith.constant 0 : i32
    %c0_i32_0 = arith.constant 0 : i32
    %c0_i32_1 = arith.constant 0 : i32
    return %c0_i32, %c0_i32_0 : i32, i32
  }
  func.func @transform_4(%arg0: i32) -> (i32, i32) {
    %c0_i32 = arith.constant 0 : i32
    %c0_i32_0 = arith.constant 0 : i32
    %c0_i32_1 = arith.constant 0 : i32
    return %c0_i32, %c0_i32_0 : i32, i32
  }
  func.func @transform_5(%arg0: i32) -> (i32, i32) {
    %c0_i32 = arith.constant 0 : i32
    %c0_i32_0 = arith.constant 0 : i32
    %c0_i32_1 = arith.constant 0 : i32
    return %c0_i32, %c0_i32_0 : i32, i32
  }
  func.func @transform_6(%arg0: i32) -> (i32, i32) {
    %c0_i32 = arith.constant 0 : i32
    %c0_i32_0 = arith.constant 0 : i32
    %c0_i32_1 = arith.constant 0 : i32
    return %c0_i32, %c0_i32_0 : i32, i32
  }
  func.func @transform_7(%arg0: i32) -> (i32, i32) {
    %c0_i32 = arith.constant 0 : i32
    %c0_i32_0 = arith.constant 0 : i32
    return %arg0, %c0_i32 : i32, i32
  }
}

</mosaic_0001>

<bundles_post_ra>
// kernel: tpu_custom_call.1
= control target key start
LH: loop header
LB: loop body
LE: loop exit
PB: predicated region body
PF: predicated region fallthrough
CT: control target
= control target key end

     0   :  { %s1258_s0 = inlined_call_operand.hbm [shape: f32[128,128], index: 0, kind: input, shape index: {}]   ;;  %s1259_s1 = inlined_call_operand.hbm [shape: f32[128,128], index: 1, kind: input, shape index: {}]   ;;  %s1260_s2 = inlined_call_operand.vmem [shape: f32[1,128], index: 2, kind: input, shape index: {}]   ;;  %s1261_s3 = inlined_call_operand.hbm [shape: f32[128,128], index: 3, kind: input, shape index: {}]   ;;  %s1262_s4 = inlined_call_operand.vmem [shape: f32[1,128], index: 4, kind: input, shape index: {}]   ;;  %s1263_s5 = inlined_call_operand.hbm [shape: f32[128,128], index: 5, kind: input, shape index: {}]   ;;  %s1264_s6 = inlined_call_operand.vmem [shape: f32[1,128], index: 6, kind: input, shape index: {}]   ;;  %s1265_s7 = inlined_call_operand.hbm [shape: f32[128,128], index: 7, kind: output, shape index: {}]  }
   0x1   :  { %1268 = sst [smem:[#allocation15_spill]] %s1259_s1 }
   0x2   :  { %12 = vsyncpa [#allocation3], 0 }
   0x3   :  { %14 = vsyncpa [#allocation3 + $0x1], 0 }
   0x4   :  { %15 = vsyncpa [#allocation6], 0 }
   0x5   :  { %16 = vsyncpa [#allocation9], 0 }
   0x6   :  { %17 = vsyncpa [#allocation4], 0 }
   0x7   :  { %19 = vsyncpa [#allocation4 + $0x1], 0  ;;  %s1065_s24 = smov 0   ;;  %s1067_s25 = smov 0  }
   0x8   :  { %s1069_s26 = smov 0   ;;  %s1071_s27 = smov 0  }
   0x9 LB: > { %s1086_s28 = sadd.s32 4294967295, %s1016_s27   ;;  %s684_s29 = sadd.s32 4294967294, %s1016_s27   ;;  %s1016_s27 = sphi %s1071_s27, %s1282_s27   ;;  %s1012_s26 = sphi %s1069_s26, %s1281_s26   ;;  %s1008_s25 = sphi %s1067_s25, %s1280_s25   ;;  %s1004_s24 = sphi %s1065_s24, %s1279_s24  }
   0xa   : > { %p45_p0 = scmp.ne.s32.totalorder %s1008_s25, %s1004_s24  ;;  %p46_p1 = scmp.eq.s32.totalorder %s1086_s28, 0 }
   0xb   : > { %p195_p2 = scmp.eq.s32.totalorder %s1086_s28, 1  ;;  %p201_p3 = scmp.eq.s32.totalorder %s684_s29, 1 }
   0xc   : > { %p1095_p4 = por %p46_p1, %p45_p0  ;;  %p685_p5 = scmp.ge.s32.totalorder %s1016_s27, 1 }
   0xd   : > { %p1100_p6 = por %p201_p3, %p45_p0  ;;  %p208_p7 = scmp.lt.s32.totalorder %s1016_s27, 3 }
   0xe   : > { %s1271_s1 = sld [smem:[#allocation15_spill]]  ;;  %s1018_s13 = smov [#allocation5]  }
   0xf   : > { %p1108_p8 = pnand %p685_p5, %p208_p7  ;;  %s221_s14 = sshll.u32 %s1018_s13, 4  ;;  %s222_s14 = int_to_ptr.vmem [resolvable:$true] %s221_s14 }
  0x10   : > { %s236_s18 = sshll.u32 %s1261_s3, 4  ;;  %s1266_s19 = smov 128   ;;  %s237_s18 = int_to_ptr.hbm [resolvable:$true] %s236_s18 }
  0x11   : > { %p754_p9 = pneg %p1108_p8  ;;  %s1267_s20 = smov 8  }
  0x12   : > { %s1021_s21 = smov [#allocation7]   ;;  %s253_s9 = sshll.u32 %s1263_s5, 4  ;;  %s254_s9 = int_to_ptr.hbm [resolvable:$true] %s253_s9 }
  0x13   : > { %p1116_p10 = pnand %p754_p9, %p46_p1  ;;  %s238_s22 = sshll.u32 %s1021_s21, 4  ;;  %s239_s22 = int_to_ptr.vmem [resolvable:$true] %s238_s22 }
  0x14   : > { %s219_s11 = sshll.u32 %s1271_s1, 4  ;;  %s1022_s10 = smov [#allocation8]   ;;  %s220_s11 = int_to_ptr.hbm [resolvable:$true] %s219_s11 }
  0x15   : > { %757 = dma.hbm_to_vmem [thread:$0]  (!%p1116_p10), %s220_s11, 2048, %s222_s14, [#allocation6], %s1266_s19, %s1266_s19, %s1267_s20  }
  0x16   : > { %760 = dma.hbm_to_vmem [thread:$0]  (!%p1116_p10), %s237_s18, 2048, %s239_s22, [#allocation6], %s1266_s19, %s1266_s19, %s1267_s20  }
  0x17   : > { %s255_s11 = sshll.u32 %s1022_s10, 4  ;;  %s1138_s13 = sadd.s32 1, %s1016_s27   ;;  %s256_s11 = int_to_ptr.vmem [resolvable:$true] %s255_s11 }
  0x18   : > { %763 = dma.hbm_to_vmem [thread:$0]  (!%p1116_p10), %s254_s9, 2048, %s256_s11, [#allocation9], %s1266_s19, %s1266_s19, %s1267_s20  }
  0x19   : > { %s29_s14 = ssub.s32 %s1016_s27, %s1138_s13  ;;  %s32_s16 = sadd.s32 1, %s1012_s26 }
  0x1a   : > { %p30_p12 = scmp.eq.s32.totalorder %s29_s14, 0  ;;  %p39_p13 = scmp.ne.s32.totalorder %s1012_s26, %s1008_s25 }
  0x1b   : > { %p40_p0 = scmp.eq.s32.totalorder %s1016_s27, 0  ;;  %p775_p5 = scmp.lt.s32.totalorder %s1016_s27, 2 }
  0x1c   : > { %s1152_s17 = scalar_select %p30_p12, %s1012_s26, %s32_s16  }
  0x1d   : > { %p1156_p3 = por %p195_p2, %p39_p13  ;;  %s272_s21 = sand.u32 1, %s1012_s26  }
  0x1e   : > { %s704_s15 = sshll.u32 %s1016_s27, 6  ;;  %p41_p7 = por %p40_p0, %p39_p13 }
  0x1f   : > { %s690_s22 = sshll.u32 %s272_s21, 6  ;;  %s281_s9 = scalar_lea.hbm %s1258_s0, %s704_s15 }
  0x20   : > { %s282_s10 = sshll.u32 %s281_s9, 4  ;;  %s276_s11 = scalar_lea.vmem [#allocation2], %s690_s22  ;;  %s283_s10 = int_to_ptr.hbm [resolvable:$true] %s282_s10 }
  0x21   : > { %s284_s14 = sshll.u32 %s276_s11, 4  ;;  %p1166_p9 = pnand %p775_p5, %p41_p7  ;;  %s285_s14 = int_to_ptr.vmem [resolvable:$true] %s284_s14 }
  0x22   : > { %s273_s19 = scalar_lea.sflag [#allocation3], %s272_s21  ;;  %s912_s20 = sshra.s32 %s283_s10, 4  ;;  %s913_s20 = int_to_ptr.hbm [resolvable:$true] %s912_s20 }
  0x23   : > { %s914_s1 = scalar_lea.hbm %s913_s20, 64  ;;  %p916_p10 = pneg %p1166_p9 }
  0x24   : > { %p915_p2 = scmp.ne.s32.totalorder %s913_s20, %s914_s1  ;;  %s919_s22 = scalar_lea.hbm %s1258_s0, 128 }
  0x25   : > { %p920_p0 = scmp.lt.s32.totalorder %s913_s20, %s1258_s0  ;;  %p921_p5 = scmp.lt.s32.totalorder %s919_s22, %s914_s1 }
  0x26   : > { %p917_p12 = pnand %p916_p10, %p915_p2 }
  0x27   : > { %p922_p7 = por %p921_p5, %p920_p0 }
  0x28   : > { %p918_p13 = pneg %p917_p12 }
  0x2a   : > { %p923_p11 = pnand %p922_p7, %p918_p13 }
  0x2c   : > { %926 = shalt.err (!%p923_p11)
}
  0x2d   : > { %s1276_s21 = smov 8   ;;  %s1277_s11 = smov 128  }
  0x2e   : > { %767 = dma.hbm_to_vmem [thread:$0]  (!%p1166_p9), %s283_s10, 1024, %s285_s14, %s273_s19, %s1277_s11, %s1277_s11, %s1276_s21  }
  0x2f   : > { %296 = sbr.rel (%p1108_p8) target bundleno = 543 (0x21f), region = 48  ;;  %s1186_s15 = sand.u32 (!%p1108_p8), 1, %s1008_s25  }
  0x30   : > { %s694_s1 = sshll.u32 (!%p1108_p8), %s1186_s15, 6  ;;  %s299_s20 = scalar_lea.sflag (!%p1108_p8), [#allocation3], %s1186_s15 }
  0x31   : > { %s1192_s23 = scalar_lea.vmem (!%p1108_p8), [#allocation2], %s694_s1 }
  0x34   : > { %987 = dma.done.wait (%p1095_p4), %s299_s20, 1024  }
  0x35   : > { %989 = vsyncadd (%p1095_p4), %s299_s20, 4294966272 }
  0x36   : > { %991 = dma.done.wait (%p46_p1), [#allocation6], 4096  }
  0x37   : > { %993 = vsyncadd (%p46_p1), [#allocation6], 4294963200 }
  0x38   : > { %995 = dma.done.wait (%p46_p1), [#allocation9], 2048  }
  0x39   : > { %997 = vsyncadd (%p46_p1), [#allocation9], 4294965248  ;;  %v374_v0 = vld [vmem:[#allocation5 + $0x78] sm:$0xff]  ;;  %v373_v1 = vld [vmem:[#allocation5 + $0x70] sm:$0xff]  ;;  %s348_s22 = scalar_lea.vmem [#allocation10], %s694_s1  ;;  %s705_s29 = sshll.u32 %s1086_s28, 6 }
  0x3a   : > { %379 = vmatpush.msra.mxu0 %v374_v0  ;;  %706 = vmatpush.msra.mxu3 %v374_v0  ;;  %v372_v2 = vld [vmem:[#allocation5 + $0x68] sm:$0xff]  ;;  %v371_v3 = vld [vmem:[#allocation5 + $0x60] sm:$0xff]  ;;  %v370_v4 = vld [vmem:[#allocation5 + $0x58] sm:$0xff]  ;;  %s578_s11 = scalar_lea.hbm %s1265_s7, %s705_s29  ;;  %s579_s1 = sshll.u32 %s348_s22, 4  ;;  %s580_s1 = int_to_ptr.vmem [resolvable:$true] %s579_s1 }
  0x3b   : > { %v369_v5 = vld [vmem:[#allocation5 + $0x50] sm:$0xff]  ;;  %v368_v6 = vld [vmem:[#allocation5 + $0x48] sm:$0xff]  ;;  %v367_v7 = vld [vmem:[#allocation5 + $0x40] sm:$0xff]  ;;  %s581_s20 = sshll.u32 %s578_s11, 4  ;;  %s962_s10 = scalar_lea.hbm %s1265_s7, 128  ;;  %s582_s20 = int_to_ptr.hbm [resolvable:$true] %s581_s20 }
  0x3c   : > { %380 = vmatpush.msra.mxu0 %v373_v1  ;;  %707 = vmatpush.msra.mxu3 %v373_v1  ;;  %v366_v8 = vld [vmem:[#allocation5 + $0x38] sm:$0xff]  ;;  %v365_v9 = vld [vmem:[#allocation5 + $0x30] sm:$0xff]  ;;  %v364_v10 = vld [vmem:[#allocation5 + $0x28] sm:$0xff]  ;;  %s956_s30 = sshra.s32 %s582_s20, 4  ;;  %s957_s30 = int_to_ptr.hbm [resolvable:$true] %s956_s30 }
  0x3d   : > { %v363_v11 = vld [vmem:[#allocation5 + $0x20] sm:$0xff]  ;;  %v362_v12 = vld [vmem:[#allocation5 + $0x18] sm:$0xff]  ;;  %v361_v13 = vld [vmem:[#allocation5 + $0x10] sm:$0xff]  ;;  %s958_s12 = scalar_lea.hbm %s957_s30, 64  ;;  %p963_p11 = scmp.lt.s32.totalorder %s957_s30, %s1265_s7 }
  0x3e   : > { %381 = vmatpush.msra.mxu0 %v372_v2  ;;  %708 = vmatpush.msra.mxu3 %v372_v2  ;;  %v360_v14 = vld [vmem:[#allocation5 + $0x8] sm:$0xff]  ;;  %v359_v15 = vld [vmem:[#allocation5] sm:$0xff]  ;;  %v357_v17 = vld [vmem:[%s1192_s23 + $0x30] sm:$0xff]  ;;  %p959_p1 = scmp.ne.s32.totalorder %s957_s30, %s958_s12  ;;  %p964_p9 = scmp.lt.s32.totalorder %s962_s10, %s958_s12 }
  0x3f   : > { %v351_v16 = vld [vmem:[%s1192_s23] sm:$0xff]  ;;  %v352_v18 = vld [vmem:[%s1192_s23 + $0x8] sm:$0xff]  ;;  %v358_v19 = vld [vmem:[%s1192_s23 + $0x38] sm:$0xff] }
  0x40   : > { %382 = vmatpush.msra.mxu0 %v371_v3  ;;  %709 = vmatpush.msra.mxu3 %v371_v3  ;;  %v443_v20 = vld [vmem:[#allocation7 + $0x78] sm:$0xff]  ;;  %v442_v21 = vld [vmem:[#allocation7 + $0x70] sm:$0xff]  ;;  %v441_v22 = vld [vmem:[#allocation7 + $0x68] sm:$0xff]  ;;  %p960_p4 = pnand %p959_p1, %p1156_p3  ;;  %p965_p2 = por %p964_p9, %p963_p11 }
  0x41   : > { %448 = vmatpush.msra.mxu1 %v443_v20  ;;  %v440_v23 = vld [vmem:[#allocation7 + $0x60] sm:$0xff]  ;;  %v353_v24 = vld [vmem:[%s1192_s23 + $0x10] sm:$0xff]  ;;  %v439_v25 = vld [vmem:[#allocation7 + $0x58] sm:$0xff] }
  0x42   : > { %383 = vmatpush.msra.mxu0 %v370_v4  ;;  %710 = vmatpush.msra.mxu3 %v370_v4  ;;  %v438_v26 = vld [vmem:[#allocation7 + $0x50] sm:$0xff]  ;;  %v437_v27 = vld [vmem:[#allocation7 + $0x48] sm:$0xff]  ;;  %v436_v28 = vld [vmem:[#allocation7 + $0x40] sm:$0xff]  ;;  %p961_p8 = pneg %p960_p4 }
  0x43   : > { %449 = vmatpush.msra.mxu1 %v442_v21  ;;  %v354_v29 = vld [vmem:[%s1192_s23 + $0x18] sm:$0xff]  ;;  %v434_v31 = vld [vmem:[#allocation7 + $0x30] sm:$0xff]  ;;  %v433_v32 = vld [vmem:[#allocation7 + $0x28] sm:$0xff] }
  0x44   : > { %384 = vmatpush.msra.mxu0 %v369_v5  ;;  %711 = vmatpush.msra.mxu3 %v369_v5  ;;  %v435_v30 = vld [vmem:[#allocation7 + $0x38] sm:$0xff]  ;;  %v432_v33 = vld [vmem:[#allocation7 + $0x20] sm:$0xff]  ;;  %v356_v36 = vld [vmem:[%s1192_s23 + $0x28] sm:$0xff]  ;;  %p966_p10 = pnand %p965_p2, %p961_p8 }
  0x45   : > { %450 = vmatpush.msra.mxu1 %v441_v22  ;;  %v355_v34 = vld [vmem:[%s1192_s23 + $0x20] sm:$0xff]  ;;  %v431_v35 = vld [vmem:[#allocation7 + $0x18] sm:$0xff]  ;;  %v430_v37 = vld [vmem:[#allocation7 + $0x10] sm:$0xff]  ;;  %s567_s23 = scalar_lea.sflag [#allocation4], %s1186_s15 }
  0x46   : > { %385 = vmatpush.msra.mxu0 %v368_v6  ;;  %712 = vmatpush.msra.mxu3 %v368_v6  ;;  %v429_v38 = vld [vmem:[#allocation7 + $0x8] sm:$0xff]  ;;  %v428_v39 = vld [vmem:[#allocation7] sm:$0xff]  ;;  %v512_v54 = vld [vmem:[#allocation8 + $0x78] sm:$0xff] }
  0x47   : > { %451 = vmatpush.msra.mxu1 %v440_v23  ;;  %v819_v40 = vld [vmem:[%s1260_s2] ss:$0 sm:$0xff]  ;;  %v511_v55 = vld [vmem:[#allocation8 + $0x70] sm:$0xff]  ;;  %517 = vmatpush.msra.mxu2 %v512_v54  ;;  %v510_v56 = vld [vmem:[#allocation8 + $0x68] sm:$0xff] }
  0x48   : > { %386 = vmatpush.msra.mxu0 %v367_v7  ;;  %713 = vmatpush.msra.mxu3 %v367_v7  ;;  %v509_v59 = vld [vmem:[#allocation8 + $0x60] sm:$0xff]  ;;  %v508_v61 = vld [vmem:[#allocation8 + $0x58] sm:$0xff]  ;;  %v507_v62 = vld [vmem:[#allocation8 + $0x50] sm:$0xff] }
  0x49   : > { %452 = vmatpush.msra.mxu1 %v439_v25  ;;  %518 = vmatpush.msra.mxu2 %v511_v55  ;;  %v506_v63 = vld [vmem:[#allocation8 + $0x48] sm:$0xff]  ;;  %v505_v2 = vld [vmem:[#allocation8 + $0x40] sm:$0xff]  ;;  %v504_v4 = vld [vmem:[#allocation8 + $0x38] sm:$0xff] }
  0x4a   : > { %387 = vmatpush.msra.mxu0 %v366_v8  ;;  %714 = vmatpush.msra.mxu3 %v366_v8  ;;  %v503_v5 = vld [vmem:[#allocation8 + $0x30] sm:$0xff]  ;;  %v502_v6 = vld [vmem:[#allocation8 + $0x28] sm:$0xff] }
  0x4b   : > { %453 = vmatpush.msra.mxu1 %v438_v26  ;;  %519 = vmatpush.msra.mxu2 %v510_v56 }
  0x4c   : > { %388 = vmatpush.msra.mxu0 %v365_v9  ;;  %715 = vmatpush.msra.mxu3 %v365_v9  ;;  %v501_v9 = vld [vmem:[#allocation8 + $0x20] sm:$0xff] }
  0x4d   : > { %454 = vmatpush.msra.mxu1 %v437_v27  ;;  %520 = vmatpush.msra.mxu2 %v509_v59 }
  0x4e   : > { %389 = vmatpush.msra.mxu0 %v364_v10  ;;  %716 = vmatpush.msra.mxu3 %v364_v10 }
  0x4f   : > { %455 = vmatpush.msra.mxu1 %v436_v28  ;;  %521 = vmatpush.msra.mxu2 %v508_v61 }
  0x50   : > { %390 = vmatpush.msra.mxu0 %v363_v11  ;;  %717 = vmatpush.msra.mxu3 %v363_v11  ;;  %v500_v11 = vld [vmem:[#allocation8 + $0x18] sm:$0xff] }
  0x51   : > { %456 = vmatpush.msra.mxu1 %v435_v30  ;;  %522 = vmatpush.msra.mxu2 %v507_v62 }
  0x52   : > { %391 = vmatpush.msra.mxu0 %v362_v12  ;;  %718 = vmatpush.msra.mxu3 %v362_v12 }
  0x53   : > { %457 = vmatpush.msra.mxu1 %v434_v31  ;;  %523 = vmatpush.msra.mxu2 %v506_v63 }
  0x54   : > { %392 = vmatpush.msra.mxu0 %v361_v13  ;;  %719 = vmatpush.msra.mxu3 %v361_v13 }
  0x55   : > { %458 = vmatpush.msra.mxu1 %v433_v32  ;;  %524 = vmatpush.msra.mxu2 %v505_v2 }
  0x56   : > { %393 = vmatpush.msra.mxu0 %v360_v14  ;;  %720 = vmatpush.msra.mxu3 %v360_v14  ;;  %v499_v14 = vld [vmem:[#allocation8 + $0x10] sm:$0xff] }
  0x57   : > { %459 = vmatpush.msra.mxu1 %v432_v33  ;;  %525 = vmatpush.msra.mxu2 %v504_v4 }
  0x58   : > { %394 = vmatpush.msra.mxu0 %v359_v15  ;;  %721 = vmatpush.msra.mxu3 %v359_v15  ;;  %v498_v15 = vld [vmem:[#allocation8 + $0x8] sm:$0xff] }
  0x59   : > { %395 = vmatmul.f32.vlgmr.msra.gmra.mxu0 %v351_v16  ;;  %413 = vmatmul.f32.vlgmr.msra.gmra.mxu3 %v357_v17  ;;  %v497_v16 = vld [vmem:[#allocation8] sm:$0xff] }
  0x5a   : > { %722 = vmatpush.msrb.mxu3 %v443_v20  ;;  %460 = vmatpush.msra.mxu1 %v431_v35  ;;  %v820_v17 = vld [vmem:[%s1262_s4] ss:$0 sm:$0xff] }
  0x5b   : > { %526 = vmatpush.msra.mxu2 %v503_v5 }
  0x5c   : > { %723 = vmatpush.msrb.mxu3 %v442_v21  ;;  %461 = vmatpush.msra.mxu1 %v430_v37 }
  0x5d   : > { %527 = vmatpush.msra.mxu2 %v502_v6 }
  0x5e   : > { %724 = vmatpush.msrb.mxu3 %v441_v22  ;;  %462 = vmatpush.msra.mxu1 %v429_v38 }
  0x5f   : > { %528 = vmatpush.msra.mxu2 %v501_v9 }
  0x60   : > { %725 = vmatpush.msrb.mxu3 %v440_v23  ;;  %463 = vmatpush.msra.mxu1 %v428_v39 }
  0x61   : > { %398 = vmatmul.f32.gmra.mxu0 %v352_v18  ;;  %416 = vmatmul.f32.gmra.mxu3 %v358_v19 }
  0x62   : > { %726 = vmatpush.msrb.mxu3 %v439_v25  ;;  %529 = vmatpush.msra.mxu2 %v500_v11 }
  0x64   : > { %727 = vmatpush.msrb.mxu3 %v438_v26  ;;  %530 = vmatpush.msra.mxu2 %v499_v14 }
  0x66   : > { %728 = vmatpush.msrb.mxu3 %v437_v27  ;;  %531 = vmatpush.msra.mxu2 %v498_v15 }
  0x68   : > { %729 = vmatpush.msrb.mxu3 %v436_v28  ;;  %532 = vmatpush.msra.mxu2 %v497_v16 }
  0x69   : > { %401 = vmatmul.f32.gmra.mxu0 %v353_v24 }
  0x6a   : > { %730 = vmatpush.msrb.mxu3 %v435_v30 }
  0x6c   : > { %731 = vmatpush.msrb.mxu3 %v434_v31 }
  0x6e   : > { %732 = vmatpush.msrb.mxu3 %v433_v32 }
  0x70   : > { %733 = vmatpush.msrb.mxu3 %v432_v33 }
  0x71   : > { %404 = vmatmul.f32.gmra.mxu0 %v354_v29 }
  0x72   : > { %734 = vmatpush.msrb.mxu3 %v431_v35 }
  0x74   : > { %735 = vmatpush.msrb.mxu3 %v430_v37 }
  0x76   : > { %736 = vmatpush.msrb.mxu3 %v429_v38 }
  0x78   : > { %737 = vmatpush.msrb.mxu3 %v428_v39 }
  0x79   : > { %407 = vmatmul.f32.gmra.mxu0 %v355_v34 }
  0x81   : > { %410 = vmatmul.f32.gmra.mxu0 %v356_v36 }
  0xd6   : > { %v396_v41 = vpop.f32.mrf.mxu0 }
  0xd7   : > { %v397_v42 = vadd.f32 %v819_v40, %v396_v41 }
  0xd9   : > { %v420_v43 = vmax.f32 %v397_v42, 0.0  ;;  %v821_v42 = vld [vmem:[%s1264_s6] ss:$0 sm:$0xff] }
  0xdb   : > { %464 = vmatmul.f32.vlgmr.msra.gmra.mxu1 %v420_v43 }
  0xdc   : > { %v414_v46 = vpop.f32.mrf.mxu3 }
  0xdd   : > { %v415_v12 = vadd.f32 %v819_v40, %v414_v46 }
  0xde   : > { %v399_v44 = vpop.f32.mrf.mxu0 }
  0xdf   : > { %v400_v45 = vadd.f32 %v819_v40, %v399_v44  ;;  %v426_v13 = vmax.f32 %v415_v12, 0.0 }
  0xe1   : > { %v421_v47 = vmax.f32 %v400_v45, 0.0 }
  0xe3   : > { %467 = vmatmul.f32.gmra.mxu1 %v421_v47 }
  0xe4   : > { %v417_v50 = vpop.f32.mrf.mxu3 }
  0xe5   : > { %v418_v52 = vadd.f32 %v819_v40, %v417_v50 }
  0xe6   : > { %v402_v48 = vpop.f32.mrf.mxu0 }
  0xe7   : > { %v403_v49 = vadd.f32 %v819_v40, %v402_v48  ;;  %v427_v53 = vmax.f32 %v418_v52, 0.0 }
  0xe9   : > { %v422_v51 = vmax.f32 %v403_v49, 0.0  ;;  %485 = vmatmul.f32.vlgmr.msrb.gmra.mxu3 %v427_v53 }
  0xeb   : > { %470 = vmatmul.f32.gmra.mxu1 %v422_v51 }
  0xee   : > { %v405_v57 = vpop.f32.mrf.mxu0 }
  0xef   : > { %v406_v58 = vadd.f32 %v819_v40, %v405_v57 }
  0xf1   : > { %v423_v60 = vmax.f32 %v406_v58, 0.0 }
  0xf3   : > { %473 = vmatmul.f32.gmra.mxu1 %v423_v60 }
  0xf6   : > { %v408_v0 = vpop.f32.mrf.mxu0 }
  0xf7   : > { %v409_v1 = vadd.f32 %v819_v40, %v408_v0 }
  0xf9   : > { %v424_v3 = vmax.f32 %v409_v1, 0.0 }
  0xfb   : > { %476 = vmatmul.f32.gmra.mxu1 %v424_v3 }
  0xfe   : > { %v411_v7 = vpop.f32.mrf.mxu0 }
  0xff   : > { %v412_v8 = vadd.f32 %v819_v40, %v411_v7 }
 0x101   : > { %v425_v10 = vmax.f32 %v412_v8, 0.0 }
 0x103   : > { %479 = vmatmul.f32.gmra.mxu1 %v425_v10 }
 0x10b   : > { %482 = vmatmul.f32.gmra.mxu1 %v426_v13 }
 0x158   : > { %v465_v18 = vpop.f32.mrf.mxu1 }
 0x159   : > { %v466_v19 = vadd.f32 %v820_v17, %v465_v18 }
 0x15b   : > { %v489_v20 = vmax.f32 %v466_v19, 0.0 }
 0x15d   : > { %533 = vmatmul.f32.vlgmr.msra.gmra.mxu2 %v489_v20 }
 0x160   : > { %v468_v21 = vpop.f32.mrf.mxu1 }
 0x161   : > { %v469_v22 = vadd.f32 %v820_v17, %v468_v21 }
 0x163   : > { %v490_v23 = vmax.f32 %v469_v22, 0.0 }
 0x165   : > { %536 = vmatmul.f32.gmra.mxu2 %v490_v23 }
 0x168   : > { %v471_v24 = vpop.f32.mrf.mxu1 }
 0x169   : > { %v472_v25 = vadd.f32 %v820_v17, %v471_v24 }
 0x16b   : > { %v491_v26 = vmax.f32 %v472_v25, 0.0 }
 0x16c   : > { %v486_v38 = vpop.f32.mrf.mxu3 }
 0x16d   : > { %539 = vmatmul.f32.gmra.mxu2 %v491_v26  ;;  %v487_v40 = vadd.f32 %v820_v17, %v486_v38 }
 0x16f   : > { %v496_v41 = vmax.f32 %v487_v40, 0.0 }
 0x170   : > { %v474_v27 = vpop.f32.mrf.mxu1 }
 0x171   : > { %v475_v28 = vadd.f32 %v820_v17, %v474_v27 }
 0x173   : > { %v492_v29 = vmax.f32 %v475_v28, 0.0 }
 0x175   : > { %542 = vmatmul.f32.gmra.mxu2 %v492_v29 }
 0x178   : > { %v477_v30 = vpop.f32.mrf.mxu1 }
 0x179   : > { %v478_v31 = vadd.f32 %v820_v17, %v477_v30 }
 0x17b   : > { %v493_v32 = vmax.f32 %v478_v31, 0.0 }
 0x17d   : > { %545 = vmatmul.f32.gmra.mxu2 %v493_v32 }
 0x180   : > { %v480_v33 = vpop.f32.mrf.mxu1 }
 0x181   : > { %v481_v34 = vadd.f32 %v820_v17, %v480_v33 }
 0x183   : > { %v494_v35 = vmax.f32 %v481_v34, 0.0 }
 0x185   : > { %548 = vmatmul.f32.gmra.mxu2 %v494_v35 }
 0x188   : > { %v483_v36 = vpop.f32.mrf.mxu1 }
 0x189   : > { %v484_v37 = vadd.f32 %v820_v17, %v483_v36 }
 0x18b   : > { %v495_v39 = vmax.f32 %v484_v37, 0.0 }
 0x18d   : > { %551 = vmatmul.f32.gmra.mxu2 %v495_v39 }
 0x195   : > { %554 = vmatmul.f32.gmra.mxu2 %v496_v41 }
 0x1e0   : > { %v534_v43 = vpop.f32.mrf.mxu2 }
 0x1e1   : > { %v535_v44 = vadd.f32 %v821_v42, %v534_v43 }
 0x1e3   : > { %558 = vst [vmem:[%s348_s22] sm:$0xff] %v535_v44 }
 0x1e8   : > { %v537_v45 = vpop.f32.mrf.mxu2 }
 0x1e9   : > { %v538_v46 = vadd.f32 %v821_v42, %v537_v45 }
 0x1eb   : > { %559 = vst [vmem:[%s348_s22 + $0x8] sm:$0xff] %v538_v46 }
 0x1f0   : > { %v540_v47 = vpop.f32.mrf.mxu2 }
 0x1f1   : > { %v541_v48 = vadd.f32 %v821_v42, %v540_v47 }
 0x1f3   : > { %560 = vst [vmem:[%s348_s22 + $0x10] sm:$0xff] %v541_v48 }
 0x1f8   : > { %v543_v49 = vpop.f32.mrf.mxu2 }
 0x1f9   : > { %v544_v50 = vadd.f32 %v821_v42, %v543_v49 }
 0x1fb   : > { %561 = vst [vmem:[%s348_s22 + $0x18] sm:$0xff] %v544_v50 }
 0x200   : > { %v546_v51 = vpop.f32.mrf.mxu2 }
 0x201   : > { %v547_v52 = vadd.f32 %v821_v42, %v546_v51 }
 0x203   : > { %562 = vst [vmem:[%s348_s22 + $0x20] sm:$0xff] %v547_v52 }
 0x208   : > { %v549_v53 = vpop.f32.mrf.mxu2 }
 0x209   : > { %v550_v54 = vadd.f32 %v821_v42, %v549_v53 }
 0x20b   : > { %563 = vst [vmem:[%s348_s22 + $0x28] sm:$0xff] %v550_v54 }
 0x210   : > { %v552_v55 = vpop.f32.mrf.mxu2 }
 0x211   : > { %v553_v56 = vadd.f32 %v821_v42, %v552_v55 }
 0x213   : > { %564 = vst [vmem:[%s348_s22 + $0x30] sm:$0xff] %v553_v56 }
 0x218   : > { %v555_v57 = vpop.f32.mrf.mxu2 }
 0x219   : > { %v556_v58 = vadd.f32 %v821_v42, %v555_v57 }
 0x21b   : > { %565 = vst [vmem:[%s348_s22 + $0x38] sm:$0xff] %v556_v58 }
 0x21c   : > { %969 = shalt.err (!%p966_p10)
}
 0x21d   : > { %s1023_s15 = smov 128   ;;  %s1024_s22 = smov 8  }
 0x21e   : > { %752 = dma.vmem_to_hbm [thread:$0]  (%p1156_p3), %s580_s1, 1024, %s582_s20, %s567_s23, %s1023_s15, %s1023_s15, %s1024_s22  }
 0x21f PF: > { %s596_s29 = sand.u32 1, %s1004_s24   ;;  %p1278_p12 = scmp.ge.s32.totalorder %s1016_s27, 2 }
 0x220   : > { %s597_s9 = scalar_lea.sflag [#allocation4], %s596_s29 }
 0x221   : > { %p769_p13 = pnand %p1278_p12, %p1100_p6 }
 0x223   : > { %p770_p0 = pneg %p769_p13 }
 0x225   : > { %999 = dma.done.wait (%p770_p0), %s597_s9, 1024  }
 0x226   : > { %1001 = vsyncadd (%p770_p0), %s597_s9, 4294966272  ;;  %p22_p5 = scmp.ge.s32.totalorder %s1138_s13, 4   ;;  %s1279_s24 = smov %s1008_s25 }
 0x227   : > { %s1280_s25 = smov %s1012_s26  ;;  %s1281_s26 = smov %s1152_s17 }
 0x228   : > { %s1282_s27 = smov %s1138_s13  ;;  %24 = sbr.rel (!%p22_p5) target bundleno = 9 (0x9), region = 105 }
 0x22d   :  { %603 = vsyncpa [#allocation3], 1 }
 0x22e   :  { %605 = vsyncpa [#allocation3 + $0x1], 1 }
 0x22f   :  { %606 = vsyncpa [#allocation6], 1 }
 0x230   :  { %607 = vsyncpa [#allocation9], 1 }
 0x231   :  { %608 = vsyncpa [#allocation4], 1 }
 0x232   :  { %610 = vsyncpa [#allocation4 + $0x1], 1 }

</bundles_post_ra>
